<compile_context>
chip_gen: v7x
topology: tpu7x:2x2x1
jax: 0.10.0
libtpu: 0.0.40
codegen_flags: <defaults>
</compile_context>

<pallas_src>
import functools

import jax
import jax.numpy as jnp
from jax.experimental import pallas as pl
from jax.experimental.pallas import tpu as pltpu

LANE = 128      # vreg lane width / MXU N granularity
SUBLANE = 8     # vreg sublane height (f32)


def _round_up(x, m):
    return ((x + m - 1) // m) * m


def _cdiv(a, b):
    return (a + b - 1) // b


def qnetwork_kernel(x_ref, w1_ref, w2_ref, w3_ref, b1_ref, b2_ref, b3_ref, o_ref):
    """Fused MLP forward on one (TB, S) batch tile.

    x_ref : (TB, S)        f32   -- K left unpadded; Mosaic pads the MXU K internally
    w1_ref: (S,    F1_p)   bf16/f32 (hidden width zero-padded to 128 lanes)
    w2_ref: (F1_p, F2_p)   bf16/f32
    w3_ref: (F2_p, A)      bf16/f32 (output width unpadded -> tiny masked store)
    b1_ref: (1, F1_p) f32,  b2_ref: (1, F2_p) f32,  b3_ref: (1, A) f32
    o_ref : (TB, A)        f32
    """
    x = x_ref[...]
    w1 = w1_ref[...]
    h1 = jnp.dot(x.astype(w1.dtype), w1, preferred_element_type=jnp.float32) + b1_ref[...]
    h1 = jnp.maximum(h1, 0.0)   # f32 VPU op (v5e-friendly even with bf16 weights)

    w2 = w2_ref[...]
    h2 = jnp.dot(h1.astype(w2.dtype), w2, preferred_element_type=jnp.float32) + b2_ref[...]
    h2 = jnp.maximum(h2, 0.0)

    w3 = w3_ref[...]
    out = jnp.dot(h2.astype(w3.dtype), w3, preferred_element_type=jnp.float32) + b3_ref[...]
    o_ref[...] = out.astype(o_ref.dtype)


def pad_params(params, param_dtype=jnp.bfloat16):
    """Zero-pad the hidden widths (fc1/fc2) to 128 lanes; leave K=state_size and
    N=action_size unpadded (full-dim blocks are legal; Mosaic pads MXU K internally).

    Weights are stored (in_features, out_features) = W_pytorch.T; biases (1, out).
    bf16 weights are MXU-native on v5e/v6e/v7x and halve weight DMA bytes; bias-add,
    ReLU and accumulation stay f32, so the only extra rounding is the activation cast
    feeding each matmul (well within DQN tolerances). Zero padding is numerically exact
    through ReLU and the final matmul.
    """
    S, F1 = params["w1"].shape
    _, F2 = params["w2"].shape
    _, A = params["w3"].shape
    F1_p, F2_p = _round_up(F1, LANE), _round_up(F2, LANE)

    def pad_w(w, r, c):
        return jnp.zeros((r, c), param_dtype).at[:w.shape[0], :w.shape[1]].set(
            w.astype(param_dtype))

    def pad_b(b, c):
        return jnp.zeros((1, c), jnp.float32).at[:, :b.shape[1]].set(
            b.astype(jnp.float32))

    return {
        "w1": pad_w(params["w1"], S, F1_p),
        "w2": pad_w(params["w2"], F1_p, F2_p),
        "w3": pad_w(params["w3"], F2_p, A),
        "b1": pad_b(params["b1"], F1_p),
        "b2": pad_b(params["b2"], F2_p),
        "b3": pad_b(params["b3"], A),
    }


@functools.partial(jax.jit, static_argnames=("tb_max",))
def qnetwork_forward(state, w1, w2, w3, b1, b2, b3, *, tb_max=2048):
    """Fused QNetwork forward: state (B, state_size) f32 -> (B, action_size) f32.

    Jitted so the (row-only) batch pad and final row slice fuse with the pallas_call
    instead of being separate HBM round trips.
    """
    B, S = state.shape
    A = w3.shape[1]

    # Balanced batch tiling: batches <= tb_max run in a single grid step (each step
    # costs ~0.35us fixed pipeline overhead, more than this layer stack's MXU time);
    # bigger batches split into near-equal, sublane-aligned tiles (300 -> 3 x 104 with
    # tb_max=128 instead of padding to 512). VMEM footprint at TB=2048 is ~2-3 MiB,
    # far under every generation's limit, so tb_max is not VMEM-constrained.
    num_tiles = max(1, _cdiv(B, tb_max))
    TB = _round_up(_cdiv(B, num_tiles), SUBLANE)
    B_p = num_tiles * TB

    x = state.astype(jnp.float32)
    if B_p != B:
        # Pad batch rows only (no lane pad of the narrow state dim). Padded rows
        # compute relu(bias) garbage; they are sliced off below.
        x = jnp.pad(x, ((0, B_p - B), (0, 0)))

    vmem = pltpu.MemorySpace.VMEM
    # Grid-invariant operands: whole array VMEM-resident, single buffer, one DMA total.
    resident = pl.BlockSpec(memory_space=vmem)

    out = pl.pallas_call(
        qnetwork_kernel,
        out_shape=jax.ShapeDtypeStruct((B_p, A), jnp.float32),
        grid=(num_tiles,),
        in_specs=[
            pl.BlockSpec((TB, S), lambda i: (i, 0)),   # only the batch tile is pipelined
            resident, resident, resident,              # w1, w2, w3
            resident, resident, resident,              # b1, b2, b3
        ],
        out_specs=pl.BlockSpec((TB, A), lambda i: (i, 0)),
        compiler_params=pltpu.CompilerParams(
            # Batch tiles are independent; shards across v7x's 2 TCs when num_tiles > 1
            # (no effect on v5e/v6e or when the whole batch fits in one tile).
            dimension_semantics=("parallel",)),
    )(x, w1, w2, w3, b1, b2, b3)

    return out if B_p == B else out[:B]


def init_params(key, state_size, action_size, fc1_units=64, fc2_units=64):
    """Deterministic init mimicking nn.Linear default U[-1/sqrt(fan_in), 1/sqrt(fan_in)].

    Weights stored as (in_features, out_features) = W_pytorch.T; biases (1, out).
    """
    ks = jax.random.split(key, 6)

    def uniform(k, shape, fan_in):
        bound = 1.0 / jnp.sqrt(jnp.float32(fan_in))
        return jax.random.uniform(k, shape, jnp.float32, -bound, bound)

    return {
        "w1": uniform(ks[0], (state_size, fc1_units), state_size),
        "b1": uniform(ks[1], (1, fc1_units), state_size),
        "w2": uniform(ks[2], (fc1_units, fc2_units), fc1_units),
        "b2": uniform(ks[3], (1, fc2_units), fc1_units),
        "w3": uniform(ks[4], (fc2_units, action_size), fc2_units),
        "b3": uniform(ks[5], (1, action_size), fc2_units),
    }


def reference_forward(state, params):
    """Plain-JAX reference of the PyTorch forward (the `x = state.view(...)` line in the
    original module is dead code -- it is immediately overwritten)."""
    h1 = jnp.maximum(state @ params["w1"] + params["b1"], 0.0)
    h2 = jnp.maximum(h1 @ params["w2"] + params["b2"], 0.0)
    return h2 @ params["w3"] + params["b3"]


if __name__ == "__main__":
    # Small shapes consistent with the module: state_size=8, action_size=4, batch=2.
    B, STATE_SIZE, ACTION_SIZE = 2, 8, 4
    key = jax.random.PRNGKey(0)
    k_params, k_state, k_big = jax.random.split(key, 3)

    params = init_params(k_params, STATE_SIZE, ACTION_SIZE)
    state = jax.random.normal(k_state, (B, STATE_SIZE), jnp.float32)
    ref = reference_forward(state, params)

    # f32 weights (tight tolerance vs reference).
    pf32 = pad_params(params, param_dtype=jnp.float32)
    out_f32 = jax.block_until_ready(
        qnetwork_forward(state, pf32["w1"], pf32["w2"], pf32["w3"],
                         pf32["b1"], pf32["b2"], pf32["b3"]))
    assert out_f32.shape == (B, ACTION_SIZE)
    assert jnp.allclose(out_f32, ref, atol=1e-5, rtol=1e-5), "f32 Pallas output mismatch"

    # bf16 weights (the default): MXU-native on all generations, f32 accumulation.
    pbf = pad_params(params)
    out_bf = jax.block_until_ready(
        qnetwork_forward(state, pbf["w1"], pbf["w2"], pbf["w3"],
                         pbf["b1"], pbf["b2"], pbf["b3"]))
    assert jnp.allclose(out_bf, ref, atol=5e-2, rtol=5e-2), "bf16 Pallas output mismatch"

    # Awkward larger batch; small tb_max forces the balanced multi-tile grid
    # (300 rows -> 3 tiles of 104, padded to 304 rather than 512).
    B_BIG = 300
    big_state = jax.random.normal(k_big, (B_BIG, STATE_SIZE), jnp.float32)
    ref_big = reference_forward(big_state, params)
    out_big = jax.block_until_ready(
        qnetwork_forward(big_state, pf32["w1"], pf32["w2"], pf32["w3"],
                         pf32["b1"], pf32["b2"], pf32["b3"], tb_max=128))
    assert out_big.shape == (B_BIG, ACTION_SIZE)
    assert jnp.allclose(out_big, ref_big, atol=1e-4, rtol=1e-4), "batched output mismatch"

    print("KERNEL_OK")
</pallas_src>

<mosaic_0001>
module attributes {stable_mosaic.version = 11 : i64} {
  func.func @qnetwork_kernel(%arg0: i32, %arg1: memref<8x8xf32, #tpu.memory_space<vmem>>, %arg2: memref<8x128xf32, #tpu.memory_space<vmem>>, %arg3: memref<128x128xf32, #tpu.memory_space<vmem>>, %arg4: memref<128x4xf32, #tpu.memory_space<vmem>>, %arg5: memref<1x128xf32, #tpu.memory_space<vmem>>, %arg6: memref<1x128xf32, #tpu.memory_space<vmem>>, %arg7: memref<1x4xf32, #tpu.memory_space<vmem>>, %arg8: memref<8x4xf32, #tpu.memory_space<vmem>>) attributes {dimension_semantics = [#tpu.dimension_semantics<parallel>], iteration_bounds = array<i64: 1>, scalar_prefetch = 0 : i64, scratch_operands = 0 : i64, tpu.core_type = #tpu.core_type<tc>, window_params = [{transform_indices = @transform_0, window_bounds = array<i64: 8, 8>}, {pipeline_mode = #tpu.pipeline_mode<synchronous>, transform_indices = @transform_1, window_bounds = array<i64: 8, 128>}, {pipeline_mode = #tpu.pipeline_mode<synchronous>, transform_indices = @transform_2, window_bounds = array<i64: 128, 128>}, {pipeline_mode = #tpu.pipeline_mode<synchronous>, transform_indices = @transform_3, window_bounds = array<i64: 128, 4>}, {pipeline_mode = #tpu.pipeline_mode<synchronous>, transform_indices = @transform_4, window_bounds = array<i64: 1, 128>}, {pipeline_mode = #tpu.pipeline_mode<synchronous>, transform_indices = @transform_5, window_bounds = array<i64: 1, 128>}, {pipeline_mode = #tpu.pipeline_mode<synchronous>, transform_indices = @transform_6, window_bounds = array<i64: 1, 4>}, {transform_indices = @transform_7, window_bounds = array<i64: 8, 4>}]} {
    %c0 = arith.constant 0 : index
    %c0_0 = arith.constant 0 : index
    %0 = vector.load %arg1[%c0, %c0_0] : memref<8x8xf32, #tpu.memory_space<vmem>>, vector<8x8xf32>
    %c0_1 = arith.constant 0 : index
    %c0_2 = arith.constant 0 : index
    %1 = vector.load %arg2[%c0_1, %c0_2] : memref<8x128xf32, #tpu.memory_space<vmem>>, vector<8x128xf32>
    %cst = arith.constant dense<0.000000e+00> : vector<8x128xf32>
    %2 = tpu.matmul %0, %1, %cst {dimension_numbers = #tpu.dot_dimension_numbers<[1], [0], [0], [1], [0, 0, 1, 1], [], []>} : vector<8x8xf32>, vector<8x128xf32>, vector<8x128xf32> -> vector<8x128xf32>
    %c0_3 = arith.constant 0 : index
    %c0_4 = arith.constant 0 : index
    %3 = vector.load %arg5[%c0_3, %c0_4] : memref<1x128xf32, #tpu.memory_space<vmem>>, vector<1x128xf32>
    %4 = vector.broadcast %3 : vector<1x128xf32> to vector<8x128xf32>
    %5 = arith.addf %2, %4 : vector<8x128xf32>
    %cst_5 = arith.constant 0.000000e+00 : f32
    %6 = vector.broadcast %cst_5 : f32 to vector<8x128xf32>
    %7 = arith.maximumf %5, %6 : vector<8x128xf32>
    %c0_6 = arith.constant 0 : index
    %c0_7 = arith.constant 0 : index
    %8 = vector.load %arg3[%c0_6, %c0_7] : memref<128x128xf32, #tpu.memory_space<vmem>>, vector<128x128xf32>
    %cst_8 = arith.constant dense<0.000000e+00> : vector<8x128xf32>
    %9 = tpu.matmul %7, %8, %cst_8 {dimension_numbers = #tpu.dot_dimension_numbers<[1], [0], [0], [1], [0, 0, 1, 1], [], []>} : vector<8x128xf32>, vector<128x128xf32>, vector<8x128xf32> -> vector<8x128xf32>
    %c0_9 = arith.constant 0 : index
    %c0_10 = arith.constant 0 : index
    %10 = vector.load %arg6[%c0_9, %c0_10] : memref<1x128xf32, #tpu.memory_space<vmem>>, vector<1x128xf32>
    %11 = vector.broadcast %10 : vector<1x128xf32> to vector<8x128xf32>
    %12 = arith.addf %9, %11 : vector<8x128xf32>
    %cst_11 = arith.constant 0.000000e+00 : f32
    %13 = vector.broadcast %cst_11 : f32 to vector<8x128xf32>
    %14 = arith.maximumf %12, %13 : vector<8x128xf32>
    %c0_12 = arith.constant 0 : index
    %c0_13 = arith.constant 0 : index
    %15 = vector.load %arg4[%c0_12, %c0_13] : memref<128x4xf32, #tpu.memory_space<vmem>>, vector<128x4xf32>
    %cst_14 = arith.constant dense<0.000000e+00> : vector<8x4xf32>
    %16 = tpu.matmul %14, %15, %cst_14 {dimension_numbers = #tpu.dot_dimension_numbers<[1], [0], [0], [1], [0, 0, 1, 1], [], []>} : vector<8x128xf32>, vector<128x4xf32>, vector<8x4xf32> -> vector<8x4xf32>
    %c0_15 = arith.constant 0 : index
    %c0_16 = arith.constant 0 : index
    %17 = vector.load %arg7[%c0_15, %c0_16] : memref<1x4xf32, #tpu.memory_space<vmem>>, vector<1x4xf32>
    %18 = vector.broadcast %17 : vector<1x4xf32> to vector<8x4xf32>
    %19 = arith.addf %16, %18 : vector<8x4xf32>
    %c0_17 = arith.constant 0 : index
    %c0_18 = arith.constant 0 : index
    %20 = vector.load %arg8[%c0_17, %c0_18] : memref<8x4xf32, #tpu.memory_space<vmem>>, vector<8x4xf32>
    tpu.vector_store %arg8[%c0_17, %c0_18], %19 {strides = array<i32>} : memref<8x4xf32, #tpu.memory_space<vmem>>, vector<8x4xf32>,
    return
  }
  func.func @transform_0(%arg0: i32) -> (i32, i32) {
    %c0_i32 = arith.constant 0 : i32
    %c0_i32_0 = arith.constant 0 : i32
    return %arg0, %c0_i32 : i32, i32
  }
  func.func @transform_1(%arg0: i32) -> (i32, i32) {
    %c0_i32 = arith.constant 0 : i32
    %c0_i32_0 = arith.constant 0 : i32
    %c0_i32_1 = arith.constant 0 : i32
    return %c0_i32, %c0_i32_0 : i32, i32
  }
  func.func @transform_2(%arg0: i32) -> (i32, i32) {
    %c0_i32 = arith.constant 0 : i32
    %c0_i32_0 = arith.constant 0 : i32
    %c0_i32_1 = arith.constant 0 : i32
    return %c0_i32, %c0_i32_0 : i32, i32
  }
  func.func @transform_3(%arg0: i32) -> (i32, i32) {
    %c0_i32 = arith.constant 0 : i32
    %c0_i32_0 = arith.constant 0 : i32
    %c0_i32_1 = arith.constant 0 : i32
    return %c0_i32, %c0_i32_0 : i32, i32
  }
  func.func @transform_4(%arg0: i32) -> (i32, i32) {
    %c0_i32 = arith.constant 0 : i32
    %c0_i32_0 = arith.constant 0 : i32
    %c0_i32_1 = arith.constant 0 : i32
    return %c0_i32, %c0_i32_0 : i32, i32
  }
  func.func @transform_5(%arg0: i32) -> (i32, i32) {
    %c0_i32 = arith.constant 0 : i32
    %c0_i32_0 = arith.constant 0 : i32
    %c0_i32_1 = arith.constant 0 : i32
    return %c0_i32, %c0_i32_0 : i32, i32
  }
  func.func @transform_6(%arg0: i32) -> (i32, i32) {
    %c0_i32 = arith.constant 0 : i32
    %c0_i32_0 = arith.constant 0 : i32
    %c0_i32_1 = arith.constant 0 : i32
    return %c0_i32, %c0_i32_0 : i32, i32
  }
  func.func @transform_7(%arg0: i32) -> (i32, i32) {
    %c0_i32 = arith.constant 0 : i32
    %c0_i32_0 = arith.constant 0 : i32
    return %arg0, %c0_i32 : i32, i32
  }
}

</mosaic_0001>

<bundles_post_ra>
// kernel: qnetwork_forward.1
= control target key start
LH: loop header
LB: loop body
LE: loop exit
PB: predicated region body
PF: predicated region fallthrough
CT: control target
= control target key end

     0   :  { %vm35_vm0 = vcmask 64512   ;;  %v469_v0 = vmov 0.0   ;;  %vm470_vm1 = vmmov 0   ;;  %v471_v4 = vmov 0.0|0.0   ;;  %s642_s1 = inlined_call_operand.vmem [shape: f32[8,128], index: 1, kind: input, shape index: {}]   ;;  %s643_s0 = inlined_call_operand.vmem [shape: f32[8,8], index: 0, kind: input, shape index: {}]   ;;  %s644_s2 = inlined_call_operand.vmem [shape: f32[128,128], index: 2, kind: input, shape index: {}]   ;;  %s645_s3 = inlined_call_operand.vmem [shape: f32[128,4], index: 3, kind: input, shape index: {}]   ;;  %s646_s4 = inlined_call_operand.vmem [shape: f32[1,128], index: 4, kind: input, shape index: {}]   ;;  %s647_s5 = inlined_call_operand.vmem [shape: f32[1,128], index: 5, kind: input, shape index: {}]   ;;  %s648_s6 = inlined_call_operand.vmem [shape: f32[1,4], index: 6, kind: input, shape index: {}]   ;;  %s649_s7 = inlined_call_operand.vmem [shape: f32[8,4], index: 7, kind: output, shape index: {}]  }
   0x1   :  { %343 = vmatprep.subr.mxu0 %v469_v0  ;;  %v27_v1 = vld [vmem:[%s642_s1] sm:$0xff]  ;;  %345 = vmatprep.mubr.msk.f32.mxu0 %vm470_vm1, %v469_v0  ;;  %v111_v5 = vld [vmem:[%s644_s2 + $0x8] sm:$0xff]  ;;  %v112_v6 = vld [vmem:[%s644_s2 + $0x10] sm:$0xff]  ;;  %vm297_vm2 = vcmask 31744  }
   0x2   :  { %v26_v2 = vld [vmem:[%s643_s0] sm:$0xff]  ;;  %344 = vmatpush3.msra.mxu0 %v27_v1  ;;  %418 = vmatprep.subr.bf16.mxu1 %v471_v4  ;;  %v113_v7 = vld [vmem:[%s644_s2 + $0x18] sm:$0xff]  ;;  %v115_v11 = vld [vmem:[%s644_s2 + $0x28] sm:$0xff] }
   0x3   :  { %v110_v3 = vld [vmem:[%s644_s2] sm:$0xff]  ;;  %346 = vmatmul.mubr.msk.f32.vlgmr.msra.gmra.mrb[0].mxu0 %vm35_vm0, %v26_v2  ;;  %380 = vmatprep.mubr.msk.f32.mxu1 %vm470_vm1, %v469_v0  ;;  %v422_v9 = vpack.c.bf16 %v113_v7, %v112_v6  ;;  %v116_v13 = vld [vmem:[%s644_s2 + $0x30] sm:$0xff]  ;;  %v117_v14 = vld [vmem:[%s644_s2 + $0x38] sm:$0xff] }
   0x4   :  { %v419_v8 = vpack.c.bf16 %v111_v5, %v110_v3  ;;  %442 = vmatprep.subr.bf16.mxu0 %v471_v4  ;;  %415 = vmatprep.mubr.msk.f32.mxu0 %vm470_vm1, %v469_v0  ;;  %v114_v10 = vld [vmem:[%s644_s2 + $0x20] sm:$0xff]  ;;  %v428_v15 = vpack.c.bf16 %v117_v14, %v116_v13  ;;  %v119_v17 = vld [vmem:[%s644_s2 + $0x48] sm:$0xff]  ;;  %v120_v19 = vld [vmem:[%s644_s2 + $0x50] sm:$0xff] }
   0x5   :  { %v425_v12 = vpack.c.bf16 %v115_v11, %v114_v10  ;;  %v118_v16 = vld [vmem:[%s644_s2 + $0x40] sm:$0xff]  ;;  %v121_v20 = vld [vmem:[%s644_s2 + $0x58] sm:$0xff]  ;;  %v123_v23 = vld [vmem:[%s644_s2 + $0x68] sm:$0xff] }
   0x6   :  { %420 = vmatpush3.bf16.msra.mxu1 %v419_v8  ;;  %v431_v18 = vpack.c.bf16 %v119_v17, %v118_v16  ;;  %v434_v21 = vpack.c.bf16 %v121_v20, %v120_v19  ;;  %v122_v22 = vld [vmem:[%s644_s2 + $0x60] sm:$0xff]  ;;  %v124_v25 = vld [vmem:[%s644_s2 + $0x70] sm:$0xff]  ;;  %v125_v26 = vld [vmem:[%s644_s2 + $0x78] sm:$0xff] }
   0x7   :  { %421 = vmatprep.subr.bf16.mxu1 %v471_v4  ;;  %v437_v24 = vpack.c.bf16 %v123_v23, %v122_v22  ;;  %v440_v27 = vpack.c.bf16 %v125_v26, %v124_v25  ;;  %v204_v28 = vld [vmem:[%s645_s3] sm:$0xff]  ;;  %v205_v29 = vld [vmem:[%s645_s3 + $0x8] sm:$0xff]  ;;  %v206_v30 = vld [vmem:[%s645_s3 + $0x10] sm:$0xff] }
   0x8   :  { %v443_v31 = vpack.c.bf16 %v205_v29, %v204_v28  ;;  %v207_v32 = vld [vmem:[%s645_s3 + $0x18] sm:$0xff]  ;;  %v208_v34 = vld [vmem:[%s645_s3 + $0x20] sm:$0xff]  ;;  %v209_v35 = vld [vmem:[%s645_s3 + $0x28] sm:$0xff] }
   0x9   :  { %v446_v33 = vpack.c.bf16 %v207_v32, %v206_v30  ;;  %v449_v36 = vpack.c.bf16 %v209_v35, %v208_v34  ;;  %v210_v37 = vld [vmem:[%s645_s3 + $0x30] sm:$0xff]  ;;  %v211_v38 = vld [vmem:[%s645_s3 + $0x38] sm:$0xff]  ;;  %v212_v40 = vld [vmem:[%s645_s3 + $0x40] sm:$0xff] }
   0xa   :  { %423 = vmatpush3.bf16.msra.mxu1 %v422_v9  ;;  %444 = vmatpush3.bf16.msra.mxu0 %v443_v31  ;;  %v452_v39 = vpack.c.bf16 %v211_v38, %v210_v37  ;;  %v213_v41 = vld [vmem:[%s645_s3 + $0x48] sm:$0xff]  ;;  %v214_v43 = vld [vmem:[%s645_s3 + $0x50] sm:$0xff]  ;;  %v215_v44 = vld [vmem:[%s645_s3 + $0x58] sm:$0xff] }
   0xb   :  { %424 = vmatprep.subr.bf16.mxu1 %v471_v4  ;;  %445 = vmatprep.subr.bf16.mxu0 %v471_v4  ;;  %v455_v42 = vpack.c.bf16 %v213_v41, %v212_v40  ;;  %v458_v45 = vpack.c.bf16 %v215_v44, %v214_v43  ;;  %v216_v46 = vld [vmem:[%s645_s3 + $0x60] sm:$0xff]  ;;  %v217_v47 = vld [vmem:[%s645_s3 + $0x68] sm:$0xff]  ;;  %v218_v54 = vld [vmem:[%s645_s3 + $0x70] sm:$0xff] }
   0xc   :  { %v461_v48 = vpack.c.bf16 %v217_v47, %v216_v46  ;;  %v303_v49 = vld [vmem:[%s646_s4] ss:$0 sm:$0xff]  ;;  %v219_v55 = vld [vmem:[%s645_s3 + $0x78] sm:$0xff] }
   0xd   :  { %v464_v56 = vpack.c.bf16 %v219_v55, %v218_v54  ;;  %v305_v57 = vld [vmem:[%s647_s5] ss:$0 sm:$0xff] }
   0xe   :  { %426 = vmatpush3.bf16.msra.mxu1 %v425_v12  ;;  %447 = vmatpush3.bf16.msra.mxu0 %v446_v33  ;;  %v306_v62 = vld [vmem:[%s648_s6] ss:$0 sm:$0xff] }
   0xf   :  { %427 = vmatprep.subr.bf16.mxu1 %v471_v4  ;;  %448 = vmatprep.subr.bf16.mxu0 %v471_v4 }
  0x12   :  { %429 = vmatpush3.bf16.msra.mxu1 %v428_v15  ;;  %450 = vmatpush3.bf16.msra.mxu0 %v449_v36 }
  0x13   :  { %430 = vmatprep.subr.bf16.mxu1 %v471_v4  ;;  %451 = vmatprep.subr.bf16.mxu0 %v471_v4 }
  0x16   :  { %432 = vmatpush3.bf16.msra.mxu1 %v431_v18  ;;  %453 = vmatpush3.bf16.msra.mxu0 %v452_v39 }
  0x17   :  { %433 = vmatprep.subr.bf16.mxu1 %v471_v4  ;;  %454 = vmatprep.subr.bf16.mxu0 %v471_v4 }
  0x1a   :  { %435 = vmatpush3.bf16.msra.mxu1 %v434_v21  ;;  %456 = vmatpush3.bf16.msra.mxu0 %v455_v42 }
  0x1b   :  { %436 = vmatprep.subr.bf16.mxu1 %v471_v4  ;;  %457 = vmatprep.subr.bf16.mxu0 %v471_v4 }
  0x1e   :  { %438 = vmatpush3.bf16.msra.mxu1 %v437_v24  ;;  %459 = vmatpush3.bf16.msra.mxu0 %v458_v45 }
  0x1f   :  { %439 = vmatprep.subr.bf16.mxu1 %v471_v4  ;;  %460 = vmatprep.subr.bf16.mxu0 %v471_v4 }
  0x22   :  { %441 = vmatpush3.bf16.msra.mxu1 %v440_v27  ;;  %462 = vmatpush3.bf16.msra.mxu0 %v461_v48 }
  0x23   :  { %463 = vmatprep.subr.bf16.mxu0 %v471_v4 }
  0x26   :  { %465 = vmatpush3.bf16.msra.mxu0 %v464_v56 }
  0xd6   :  { %v105_v50 = vpop.f32.mrb[0].mxu0 }
  0xd7   :  { %v106_v51 = vadd.f32 %v303_v49, %v105_v50  ;;  %v347_v52 = vpop.f32.mrb[1].mxu0 }
  0xd9   :  { %v109_v53 = vmax.f32 %v106_v51, 0.0 }
  0xdb   :  { %381 = vmatmul.mubr.f32.vlgmr.msra.gmra.mrb[0].mxu1 %v109_v53 }
 0x1ae   :  { %v199_v58 = vpop.f32.mrb[0].mxu1 }
 0x1af   :  { %v200_v59 = vadd.f32 %v305_v57, %v199_v58  ;;  %v382_v60 = vpop.f32.mrb[1].mxu1 }
 0x1b1   :  { %v203_v61 = vmax.f32 %v200_v59, 0.0 }
 0x1b3   :  { %416 = vmatmul.mubr.f32.vlgmr.msra.gmra.mrb[2].mxu0 %v203_v61 }
 0x286   :  { %v293_v63 = vpop.f32.mrb[2].mxu0 }
 0x287   :  { %v294_v0 = vadd.f32 %v306_v62, %v293_v63  ;;  %v417_v1 = vpop.f32.mrb[3].mxu0 }
 0x289   :  { %298 = vst.msk [vmem:[%s649_s7] sm:$0xff] %vm297_vm2, %v294_v0 }

</bundles_post_ra>
